<compile_context>
chip_gen: v7x
topology: tpu7x:2x2x1
jax: 0.10.0
libtpu: 0.0.40
codegen_flags: <defaults>
</compile_context>

<pallas_src>
import functools

import jax
import jax.numpy as jnp
from jax import lax
from jax.experimental import pallas as pl
from jax.experimental.pallas import tpu as pltpu


def _round_down(x, m):
    return (x // m) * m


def _vmem_capacity_bytes():
    try:
        return int(pltpu.get_tpu_info().vmem_capacity_bytes)
    except Exception:
        return 64 << 20          # most conservative generation (v7x)


def _per_column_bytes(C, act_bytes):
    # VMEM working set per time column:
    #   2x double-buffered input (act_bytes) + 2x double-buffered f32 output
    #   + halo-extended f32 slab + (2C, tile) ycat temp + (C, tile) yt temp.
    return C * (2 * act_bytes + 2 * 4 + 4 + 2 * 4 + 4)


def _pick_time_tile(C, T, act_bytes, want=1024):
    """Time tile (lanes): multiple of 128, or the full T when one block
    suffices (block dims == full array dims are always legal)."""
    budget = min(_vmem_capacity_bytes() // 3, 24 << 20)
    tile_cap = max(128, _round_down(budget // _per_column_bytes(C, act_bytes), 128))
    tile = max(128, _round_down(min(want, tile_cap), 128))
    if tile >= T:
        return T
    return tile


# ---------------------------------------------------------------------------
# in-kernel helpers
# ---------------------------------------------------------------------------
def _halo_extend(x_ref, halo_ref, *, pad, tile, t_true):
    """Build the halo-extended f32 slab for this time tile.

    Returns (xfull, L) with xfull[:, u] == reflect_pad(x)[:, i*tile + u] for
    every u in [0, L - 1 + 2*pad], where L = number of in-range columns of the
    tile (columns past that are don't-care: they only feed masked stats or
    out-of-bounds output columns that Pallas never writes back).
    """
    i = pl.program_id(1)
    L = jnp.minimum(tile, t_true - i * tile)
    xc = x_ref[...].astype(jnp.float32)                     # (C, tile)
    if pad == 0:
        return xc, L

    halo = halo_ref[...].astype(jnp.float32)                # (C, 2*pad)
    lh, rh = halo[:, :pad], halo[:, pad:]
    xfull = jnp.concatenate([lh, xc, rh], axis=1)           # (C, tile + 2*pad)

    if t_true % tile != 0:
        # Ragged last tile: the right-boundary (reflected) columns belong at
        # u = pad + L + q, not at the static end.  Fix with per-column selects
        # (pad is tiny); never touches valid columns u < pad + L.
        ucol = lax.broadcasted_iota(jnp.int32, (1, tile + 2 * pad), 1)
        for q in range(pad):
            xfull = jnp.where(ucol == pad + L + q, rh[:, q:q + 1], xfull)
    return xfull, L


def _depthwise(xfull, wt, *, dil, ksize, tile):
    """Depthwise dilated conv as K shifted multiply-adds on the VPU.
    xfull: (C, tile + 2*pad) f32, wt: (C, K) f32 -> (C, tile) f32."""
    yt = wt[:, 0:1] * xfull[:, 0:tile]
    for j in range(1, ksize):
        off = j * dil
        yt = yt + wt[:, j:j + 1] * xfull[:, off:off + tile]
    return yt


# ---------------------------------------------------------------------------
# pass 1: per-(batch, tile) partial BatchNorm statistics
# ---------------------------------------------------------------------------
def _stats_kernel(x_ref, halo_ref, wf_ref, wt_ref, stats_ref, *,
                  pad, dil, ksize, tile, t_true, mxu_dtype):
    xfull, L = _halo_extend(x_ref, halo_ref, pad=pad, tile=tile, t_true=t_true)

    # block_f pre-BN: 1x1 conv == channel-mixing matmul (MXU, f32 accumulate).
    yf = jnp.dot(wf_ref[...], x_ref[...].astype(mxu_dtype),
                 preferred_element_type=jnp.float32)        # (C, tile)
    # block_t pre-BN: depthwise dilated conv on the halo-extended slab.
    yt = _depthwise(xfull, wt_ref[...], dil=dil, ksize=ksize, tile=tile)

    # Exclude the out-of-range tail of a partial last tile via select (not a
    # multiply), so unspecified block-padding values can never leak NaN/Inf
    # into the sums.
    col = lax.broadcasted_iota(jnp.int32, (1, tile), 1)
    valid = col < L
    stats_ref[...] = jnp.concatenate(                       # (C, 4)
        [jnp.sum(jnp.where(valid, yf, 0.0), axis=1, keepdims=True),
         jnp.sum(jnp.where(valid, yf * yf, 0.0), axis=1, keepdims=True),
         jnp.sum(jnp.where(valid, yt, 0.0), axis=1, keepdims=True),
         jnp.sum(jnp.where(valid, yt * yt, 0.0), axis=1, keepdims=True)],
        axis=1)


# ---------------------------------------------------------------------------
# pass 2: fused shortcut + folded-BN branches, single store per tile
# ---------------------------------------------------------------------------
def _apply_kernel(x_ref, halo_ref, wcat_ref, wt_ref, bs_ref, aff_ref, out_ref, *,
                  pad, dil, ksize, tile, t_true, mxu_dtype):
    C = out_ref.shape[0]
    xfull, _ = _halo_extend(x_ref, halo_ref, pad=pad, tile=tile, t_true=t_true)

    # Fused 1x1 convs: rows [0, C) = shortcut weight, rows [C, 2C) = block_f.
    # (Assumes C % 8 == 0 for a free sublane split; otherwise correct but may
    # trigger a relayout copy.)
    ycat = jnp.dot(wcat_ref[...], x_ref[...].astype(mxu_dtype),
                   preferred_element_type=jnp.float32)      # (2C, tile)

    aff = aff_ref[...]                                      # (C, 4)
    zf = ycat[C:] * aff[:, 0:1] + aff[:, 1:2]               # folded BN (block_f)

    yt = _depthwise(xfull, wt_ref[...], dil=dil, ksize=ksize, tile=tile)
    zt = yt * aff[:, 2:3] + aff[:, 3:4]                     # folded BN (block_t)

    # Single store: shortcut(+bias) + leaky(bn_f) + leaky(bn_t).
    out = (ycat[:C] + bs_ref[...]
           + jnp.maximum(zf, 0.2 * zf) + jnp.maximum(zt, 0.2 * zt))
    out_ref[...] = out.astype(out_ref.dtype)


# ---------------------------------------------------------------------------
# wrapper
# ---------------------------------------------------------------------------
def resblock1dtf(x, params, *, dilation=1, kernel_size=3, eps=1e-5,
                 time_tile=1024, mxu_dtype=jnp.bfloat16):
    """ResBlock1dTF forward.  x: (B, C, T) float32 -> (B, C, T) float32."""
    B, C, T = x.shape
    assert kernel_size % 2 == 1, "odd kernel_size required (module keeps length T)"
    pad = dilation * (kernel_size // 2)
    assert pad <= T - 1, "ReflectionPad1d requires dilation*(k//2) <= T-1"

    mxu_dtype = jnp.dtype(mxu_dtype)
    # bf16 fast path also ships the activation as bf16 (halves input HBM bytes
    # on a memory-bound kernel); exact mode keeps f32 end-to-end.
    act_dtype = (jnp.dtype(jnp.bfloat16) if mxu_dtype == jnp.dtype(jnp.bfloat16)
                 else jnp.dtype(jnp.float32))
    act_bytes = act_dtype.itemsize

    tile = _pick_time_tile(C, T, act_bytes, want=time_tile)
    n_tiles = pl.cdiv(T, tile)

    # ---- tiny per-tile halo columns (reflection at the sequence boundaries
    # already applied); the bulk activation is shipped untouched, once/pass.
    halo_w = max(2 * pad, 1)
    if pad > 0:
        starts = jnp.arange(n_tiles, dtype=jnp.int32) * tile
        valid_len = jnp.minimum(tile, T - starts)                  # (n_tiles,)
        q = jnp.arange(pad, dtype=jnp.int32)

        def refl(m):                      # padded coordinate -> raw column
            r = m - pad
            r = jnp.where(r < 0, -r, r)
            return jnp.where(r >= T, 2 * (T - 1) - r, r)

        lidx = refl(starts[:, None] + q[None, :])
        ridx = refl(starts[:, None] + pad + valid_len[:, None] + q[None, :])
        hidx = jnp.concatenate([lidx, ridx], axis=1).reshape(-1)   # (nt*2p,)
        halos = jnp.take(x, hidx, axis=2).reshape(B, C, n_tiles, 2 * pad)
        halos = jnp.transpose(halos, (0, 2, 1, 3))                 # (B,nt,C,2p)
    else:
        halos = jnp.zeros((B, n_tiles, C, 1), x.dtype)

    x_in = x.astype(act_dtype)
    halos = halos.astype(act_dtype)
    wf = params["wf"].astype(mxu_dtype)                            # pre-cast
    wcat = jnp.concatenate([params["ws"], params["wf"]], axis=0).astype(mxu_dtype)
    wt = jnp.transpose(params["wt"][:, :, 0], (1, 0)).astype(jnp.float32)  # (C, K)

    # ---- generation-aware scoped-VMEM limit, consistent with the tile model.
    need = (_per_column_bytes(C, act_bytes) * tile
            + (2 * C * C + C * kernel_size + 8 * C) * 4
            + 4 * C * halo_w * act_bytes)
    cap = _vmem_capacity_bytes()
    vmem_limit = int(min(cap * 3 // 4, max(2 * need + (4 << 20), 32 << 20)))
    cparams = pltpu.CompilerParams(
        dimension_semantics=("parallel", "parallel"),   # megacore / v7x 2 TCs
        vmem_limit_bytes=vmem_limit)

    dw_flops = 2 * kernel_size * C * B * n_tiles * tile
    act_read = B * C * T * act_bytes

    # ---- pass 1: partial stats per (batch, tile) ---------------------------
    stats_cost = pl.CostEstimate(
        flops=2 * C * C * B * n_tiles * tile + dw_flops + 8 * C * B * n_tiles * tile,
        transcendentals=0,
        bytes_accessed=act_read + B * n_tiles * C * 16
        + (C * C + kernel_size * C) * 4)

    stats = pl.pallas_call(
        functools.partial(_stats_kernel, pad=pad, dil=dilation,
                          ksize=kernel_size, tile=tile, t_true=T,
                          mxu_dtype=mxu_dtype),
        out_shape=jax.ShapeDtypeStruct((B, n_tiles, C, 4), jnp.float32),
        grid_spec=pltpu.PrefetchScalarGridSpec(
            num_scalar_prefetch=0,
            grid=(B, n_tiles),
            in_specs=[
                pl.BlockSpec((None, C, tile), lambda b, i: (b, 0, i)),
                pl.BlockSpec((None, None, C, halo_w), lambda b, i: (b, i, 0, 0)),
                pl.BlockSpec((C, C), lambda b, i: (0, 0)),
                pl.BlockSpec((C, kernel_size), lambda b, i: (0, 0)),
            ],
            out_specs=pl.BlockSpec((None, None, C, 4), lambda b, i: (b, i, 0, 0)),
        ),
        compiler_params=cparams,
        cost_estimate=stats_cost,
    )(x_in, halos, wf, wt)

    # ---- tiny host-side reduction: global mean/var -> per-channel affine ---
    s = jnp.sum(stats, axis=(0, 1))                  # (C, 4)
    n = float(B * T)
    mean_f, mean_t = s[:, 0] / n, s[:, 2] / n
    # One-pass var E[y^2]-E[y]^2 in f32; clamp against cancellation going <0.
    var_f = jnp.maximum(s[:, 1] / n - mean_f * mean_f, 0.0)
    var_t = jnp.maximum(s[:, 3] / n - mean_t * mean_t, 0.0)
    scale_f = params["gf"][:, 0] * lax.rsqrt(var_f + eps)
    scale_t = params["gt"][:, 0] * lax.rsqrt(var_t + eps)
    affine = jnp.stack([scale_f, params["bf"][:, 0] - mean_f * scale_f,
                        scale_t, params["bt"][:, 0] - mean_t * scale_t],
                       axis=1)                       # (C, 4)

    # ---- pass 2: fused output, written straight into (B, C, T) -------------
    apply_cost = pl.CostEstimate(
        flops=2 * (2 * C) * C * B * n_tiles * tile + dw_flops
        + 10 * C * B * n_tiles * tile,
        transcendentals=0,
        bytes_accessed=act_read + B * C * T * 4
        + (2 * C * C + kernel_size * C + 5 * C) * 4)

    out = pl.pallas_call(
        functools.partial(_apply_kernel, pad=pad, dil=dilation,
                          ksize=kernel_size, tile=tile, t_true=T,
                          mxu_dtype=mxu_dtype),
        out_shape=jax.ShapeDtypeStruct((B, C, T), x.dtype),
        grid_spec=pltpu.PrefetchScalarGridSpec(
            num_scalar_prefetch=0,
            grid=(B, n_tiles),
            in_specs=[
                pl.BlockSpec((None, C, tile), lambda b, i: (b, 0, i)),
                pl.BlockSpec((None, None, C, halo_w), lambda b, i: (b, i, 0, 0)),
                pl.BlockSpec((2 * C, C), lambda b, i: (0, 0)),
                pl.BlockSpec((C, kernel_size), lambda b, i: (0, 0)),
                pl.BlockSpec((C, 1), lambda b, i: (0, 0)),
                pl.BlockSpec((C, 4), lambda b, i: (0, 0)),
            ],
            out_specs=pl.BlockSpec((None, C, tile), lambda b, i: (b, 0, i)),
        ),
        compiler_params=cparams,
        cost_estimate=apply_cost,
    )(x_in, halos, wcat, wt, params["bs"], affine)

    return out


# ---------------------------------------------------------------------------
# pure-JAX reference (independent of the kernels)
# ---------------------------------------------------------------------------
def resblock1dtf_reference(x, params, *, dilation=1, kernel_size=3, eps=1e-5):
    C = x.shape[1]
    dn = lax.conv_dimension_numbers(x.shape, (C, C, 1), ("NCH", "OIH", "NCH"))

    def conv1x1(inp, w):
        return lax.conv_general_dilated(inp, w[:, :, None], (1,), "VALID",
                                        dimension_numbers=dn)

    ys = conv1x1(x, params["ws"]) + params["bs"][None]
    yf = conv1x1(x, params["wf"])

    pad = dilation * (kernel_size // 2)
    xpad = jnp.pad(x, ((0, 0), (0, 0), (pad, pad)), mode="reflect")
    wt = jnp.transpose(params["wt"], (1, 2, 0))   # (K,C,1) -> (C,1,K)
    dn_dw = lax.conv_dimension_numbers(xpad.shape, (C, 1, kernel_size),
                                       ("NCH", "OIH", "NCH"))
    yt = lax.conv_general_dilated(xpad, wt, (1,), "VALID",
                                  rhs_dilation=(dilation,),
                                  dimension_numbers=dn_dw,
                                  feature_group_count=C)

    def bn(y, gamma, beta):
        mean = jnp.mean(y, axis=(0, 2), keepdims=True)
        var = jnp.mean(jnp.square(y - mean), axis=(0, 2), keepdims=True)
        return (y - mean) * lax.rsqrt(var + eps) * gamma[None] + beta[None]

    leaky = lambda z: jnp.maximum(z, 0.2 * z)
    return ys + leaky(bn(yf, params["gf"], params["bf"])) \
              + leaky(bn(yt, params["gt"], params["bt"]))


def init_params(key, dim, kernel_size):
    ks = jax.random.split(key, 8)
    return {
        "ws": 0.3 * jax.random.normal(ks[0], (dim, dim), jnp.float32),
        "bs": 0.1 * jax.random.normal(ks[1], (dim, 1), jnp.float32),
        "wf": 0.3 * jax.random.normal(ks[2], (dim, dim), jnp.float32),
        "wt": 0.3 * jax.random.normal(ks[3], (kernel_size, dim, 1), jnp.float32),
        "gf": 1.0 + 0.1 * jax.random.normal(ks[4], (dim, 1), jnp.float32),
        "bf": 0.1 * jax.random.normal(ks[5], (dim, 1), jnp.float32),
        "gt": 1.0 + 0.1 * jax.random.normal(ks[6], (dim, 1), jnp.float32),
        "bt": 0.1 * jax.random.normal(ks[7], (dim, 1), jnp.float32),
    }


if __name__ == "__main__":
    B, C, T = 2, 8, 16            # small demo shapes: batch=2, dim=8, time=16
    dilation, kernel_size = 1, 3

    key = jax.random.PRNGKey(0)
    kx, kp, kx2 = jax.random.split(key, 3)
    x = jax.random.normal(kx, (B, C, T), jnp.float32)
    params = init_params(kp, C, kernel_size)

    ref = resblock1dtf_reference(x, params, dilation=dilation,
                                 kernel_size=kernel_size)

    # Exact mode (f32 activations + f32 MXU operands): tight tolerance.
    run_f32 = jax.jit(functools.partial(resblock1dtf, dilation=dilation,
                                        kernel_size=kernel_size,
                                        mxu_dtype=jnp.float32))
    out_f32 = jax.block_until_ready(run_f32(x, params))
    assert out_f32.shape == (B, C, T)
    err_f32 = float(jnp.max(jnp.abs(out_f32 - ref)))
    assert err_f32 < 1e-3, f"f32-mode max abs err {err_f32}"

    # Default fast path (bf16 activation transport + bf16 MXU operands, f32
    # accumulation / BN math): loose tolerance covering bf16 rounding of the
    # inputs and of the batch statistics.
    run_bf16 = jax.jit(functools.partial(resblock1dtf, dilation=dilation,
                                         kernel_size=kernel_size))
    out_bf16 = jax.block_until_ready(run_bf16(x, params))
    assert out_bf16.shape == (B, C, T)
    err_bf16 = float(jnp.max(jnp.abs(out_bf16 - ref)))
    assert err_bf16 < 0.15, f"bf16-mode max abs err {err_bf16}"

    # Multi-tile / ragged-tail path: T not a multiple of the time tile, so the
    # cross-tile halos, boundary reflection placement, masked stats and the
    # partial output block are all exercised.
    T2 = 200
    x2 = jax.random.normal(kx2, (B, C, T2), jnp.float32)
    run_mt = jax.jit(functools.partial(resblock1dtf, dilation=dilation,
                                       kernel_size=kernel_size,
                                       time_tile=128, mxu_dtype=jnp.float32))
    out_mt = jax.block_until_ready(run_mt(x2, params))
    assert out_mt.shape == (B, C, T2)
    ref_mt = resblock1dtf_reference(x2, params, dilation=dilation,
                                    kernel_size=kernel_size)
    err_mt = float(jnp.max(jnp.abs(out_mt - ref_mt)))
    assert err_mt < 2e-3, f"multi-tile max abs err {err_mt}"

    print("KERNEL_OK")
</pallas_src>

<mosaic_0001>
module attributes {stable_mosaic.version = 11 : i64} {
  func.func @_stats_kernel(%arg0: i32, %arg1: i32, %arg2: memref<1x8x16xf32, #tpu.memory_space<vmem>>, %arg3: memref<1x1x8x2xf32, #tpu.memory_space<vmem>>, %arg4: memref<8x8xf32, #tpu.memory_space<vmem>>, %arg5: memref<8x3xf32, #tpu.memory_space<vmem>>, %arg6: memref<1x1x8x4xf32, #tpu.memory_space<vmem>>) attributes {dimension_semantics = [#tpu.dimension_semantics<parallel>, #tpu.dimension_semantics<parallel>], iteration_bounds = array<i64: 2, 1>, scalar_prefetch = 0 : i64, scratch_operands = 0 : i64, tpu.core_type = #tpu.core_type<tc>, window_params = [{transform_indices = @transform_0, window_bounds = array<i64: 1, 8, 16>}, {transform_indices = @transform_1, window_bounds = array<i64: 1, 1, 8, 2>}, {pipeline_mode = #tpu.pipeline_mode<synchronous>, transform_indices = @transform_2, window_bounds = array<i64: 8, 8>}, {pipeline_mode = #tpu.pipeline_mode<synchronous>, transform_indices = @transform_3, window_bounds = array<i64: 8, 3>}, {transform_indices = @transform_4, window_bounds = array<i64: 1, 1, 8, 4>}]} {
    %c16_i32 = arith.constant 16 : i32
    %0 = arith.muli %arg1, %c16_i32 : i32
    %c16_i32_0 = arith.constant 16 : i32
    %1 = arith.subi %c16_i32_0, %0 : i32
    %c16_i32_1 = arith.constant 16 : i32
    %2 = arith.minsi %c16_i32_1, %1 : i32
    %c0 = arith.constant 0 : index
    %c0_2 = arith.constant 0 : index
    %c0_3 = arith.constant 0 : index
    %3 = vector.load %arg2[%c0, %c0_2, %c0_3] : memref<1x8x16xf32, #tpu.memory_space<vmem>>, vector<1x8x16xf32>
    %4 = vector.shape_cast %3 : vector<1x8x16xf32> to vector<8x16xf32>
    %c0_4 = arith.constant 0 : index
    %c0_5 = arith.constant 0 : index
    %c0_6 = arith.constant 0 : index
    %c0_7 = arith.constant 0 : index
    %5 = vector.load %arg3[%c0_4, %c0_5, %c0_6, %c0_7] : memref<1x1x8x2xf32, #tpu.memory_space<vmem>>, vector<1x1x8x2xf32>
    %6 = vector.shape_cast %5 : vector<1x1x8x2xf32> to vector<8x2xf32>
    %7 = vector.extract_strided_slice %6 {offsets = [0, 0], sizes = [8, 1], strides = [1, 1]} : vector<8x2xf32> to vector<8x1xf32>
    %8 = vector.extract_strided_slice %6 {offsets = [0, 1], sizes = [8, 1], strides = [1, 1]} : vector<8x2xf32> to vector<8x1xf32>
    %9 = tpu.concatenate %7, %4, %8 in 1 : vector<8x1xf32>, vector<8x16xf32>, vector<8x1xf32> -> vector<8x18xf32>
    %c0_8 = arith.constant 0 : index
    %c0_9 = arith.constant 0 : index
    %10 = vector.load %arg4[%c0_8, %c0_9] : memref<8x8xf32, #tpu.memory_space<vmem>>, vector<8x8xf32>
    %c0_10 = arith.constant 0 : index
    %c0_11 = arith.constant 0 : index
    %c0_12 = arith.constant 0 : index
    %11 = vector.load %arg2[%c0_10, %c0_11, %c0_12] : memref<1x8x16xf32, #tpu.memory_space<vmem>>, vector<1x8x16xf32>
    %12 = vector.shape_cast %11 : vector<1x8x16xf32> to vector<8x16xf32>
    %cst = arith.constant dense<0.000000e+00> : vector<8x16xf32>
    %13 = tpu.matmul %10, %12, %cst {dimension_numbers = #tpu.dot_dimension_numbers<[1], [0], [0], [1], [0, 0, 1, 1], [], []>} : vector<8x8xf32>, vector<8x16xf32>, vector<8x16xf32> -> vector<8x16xf32>
    %c0_13 = arith.constant 0 : index
    %c0_14 = arith.constant 0 : index
    %14 = vector.load %arg5[%c0_13, %c0_14] : memref<8x3xf32, #tpu.memory_space<vmem>>, vector<8x3xf32>
    %15 = vector.extract_strided_slice %14 {offsets = [0, 0], sizes = [8, 1], strides = [1, 1]} : vector<8x3xf32> to vector<8x1xf32>
    %16 = vector.extract_strided_slice %9 {offsets = [0, 0], sizes = [8, 16], strides = [1, 1]} : vector<8x18xf32> to vector<8x16xf32>
    %17 = vector.broadcast %15 : vector<8x1xf32> to vector<8x16xf32>
    %18 = arith.mulf %17, %16 : vector<8x16xf32>
    %19 = vector.extract_strided_slice %14 {offsets = [0, 1], sizes = [8, 1], strides = [1, 1]} : vector<8x3xf32> to vector<8x1xf32>
    %20 = vector.extract_strided_slice %9 {offsets = [0, 1], sizes = [8, 16], strides = [1, 1]} : vector<8x18xf32> to vector<8x16xf32>
    %21 = vector.broadcast %19 : vector<8x1xf32> to vector<8x16xf32>
    %22 = arith.mulf %21, %20 : vector<8x16xf32>
    %23 = arith.addf %18, %22 : vector<8x16xf32>
    %24 = vector.extract_strided_slice %14 {offsets = [0, 2], sizes = [8, 1], strides = [1, 1]} : vector<8x3xf32> to vector<8x1xf32>
    %25 = vector.extract_strided_slice %9 {offsets = [0, 2], sizes = [8, 16], strides = [1, 1]} : vector<8x18xf32> to vector<8x16xf32>
    %26 = vector.broadcast %24 : vector<8x1xf32> to vector<8x16xf32>
    %27 = arith.mulf %26, %25 : vector<8x16xf32>
    %28 = arith.addf %23, %27 : vector<8x16xf32>
    %29 = tpu.iota {dimensions = array<i32: 1>} : vector<1x16xi32>
    %30 = vector.broadcast %2 : i32 to vector<1x16xi32>
    %31 = arith.cmpi slt, %29, %30 : vector<1x16xi32>
    %cst_15 = arith.constant 0.000000e+00 : f32
    %32 = vector.shape_cast %31 : vector<1x16xi1> to vector<1x16xi1>
    %33 = vector.broadcast %32 : vector<1x16xi1> to vector<8x16xi1>
    %34 = vector.broadcast %cst_15 : f32 to vector<8x16xf32>
    %35 = arith.select %33, %13, %34 : vector<8x16xi1>, vector<8x16xf32>
    %cst_16 = arith.constant dense<0.000000e+00> : vector<8xf32>
    %36 = vector.multi_reduction <add>, %35, %cst_16 [1] : vector<8x16xf32> to vector<8xf32>
    %37 = vector.shape_cast %36 : vector<8xf32> to vector<8x1xf32>
    %38 = arith.mulf %13, %13 : vector<8x16xf32>
    %cst_17 = arith.constant 0.000000e+00 : f32
    %39 = vector.shape_cast %31 : vector<1x16xi1> to vector<1x16xi1>
    %40 = vector.broadcast %39 : vector<1x16xi1> to vector<8x16xi1>
    %41 = vector.broadcast %cst_17 : f32 to vector<8x16xf32>
    %42 = arith.select %40, %38, %41 : vector<8x16xi1>, vector<8x16xf32>
    %cst_18 = arith.constant dense<0.000000e+00> : vector<8xf32>
    %43 = vector.multi_reduction <add>, %42, %cst_18 [1] : vector<8x16xf32> to vector<8xf32>
    %44 = vector.shape_cast %43 : vector<8xf32> to vector<8x1xf32>
    %cst_19 = arith.constant 0.000000e+00 : f32
    %45 = vector.shape_cast %31 : vector<1x16xi1> to vector<1x16xi1>
    %46 = vector.broadcast %45 : vector<1x16xi1> to vector<8x16xi1>
    %47 = vector.broadcast %cst_19 : f32 to vector<8x16xf32>
    %48 = arith.select %46, %28, %47 : vector<8x16xi1>, vector<8x16xf32>
    %cst_20 = arith.constant dense<0.000000e+00> : vector<8xf32>
    %49 = vector.multi_reduction <add>, %48, %cst_20 [1] : vector<8x16xf32> to vector<8xf32>
    %50 = vector.shape_cast %49 : vector<8xf32> to vector<8x1xf32>
    %51 = arith.mulf %28, %28 : vector<8x16xf32>
    %cst_21 = arith.constant 0.000000e+00 : f32
    %52 = vector.shape_cast %31 : vector<1x16xi1> to vector<1x16xi1>
    %53 = vector.broadcast %52 : vector<1x16xi1> to vector<8x16xi1>
    %54 = vector.broadcast %cst_21 : f32 to vector<8x16xf32>
    %55 = arith.select %53, %51, %54 : vector<8x16xi1>, vector<8x16xf32>
    %cst_22 = arith.constant dense<0.000000e+00> : vector<8xf32>
    %56 = vector.multi_reduction <add>, %55, %cst_22 [1] : vector<8x16xf32> to vector<8xf32>
    %57 = vector.shape_cast %56 : vector<8xf32> to vector<8x1xf32>
    %58 = tpu.concatenate %37, %44, %50, %57 in 1 : vector<8x1xf32>, vector<8x1xf32>, vector<8x1xf32>, vector<8x1xf32> -> vector<8x4xf32>
    %c0_23 = arith.constant 0 : index
    %c0_24 = arith.constant 0 : index
    %c0_25 = arith.constant 0 : index
    %c0_26 = arith.constant 0 : index
    %59 = vector.load %arg6[%c0_23, %c0_24, %c0_25, %c0_26] : memref<1x1x8x4xf32, #tpu.memory_space<vmem>>, vector<1x1x8x4xf32>
    %60 = vector.shape_cast %59 : vector<1x1x8x4xf32> to vector<8x4xf32>
    %61 = vector.shape_cast %58 : vector<8x4xf32> to vector<1x1x8x4xf32>
    tpu.vector_store %arg6[%c0_23, %c0_24, %c0_25, %c0_26], %61 {strides = array<i32>} : memref<1x1x8x4xf32, #tpu.memory_space<vmem>>, vector<1x1x8x4xf32>,
    return
  }
  func.func @transform_0(%arg0: i32, %arg1: i32) -> (i32, i32, i32) {
    %c0_i32 = arith.constant 0 : i32
    %c0_i32_0 = arith.constant 0 : i32
    return %arg0, %c0_i32, %arg1 : i32, i32, i32
  }
  func.func @transform_1(%arg0: i32, %arg1: i32) -> (i32, i32, i32, i32) {
    %c0_i32 = arith.constant 0 : i32
    %c0_i32_0 = arith.constant 0 : i32
    %c0_i32_1 = arith.constant 0 : i32
    return %arg0, %arg1, %c0_i32, %c0_i32_0 : i32, i32, i32, i32
  }
  func.func @transform_2(%arg0: i32, %arg1: i32) -> (i32, i32) {
    %c0_i32 = arith.constant 0 : i32
    %c0_i32_0 = arith.constant 0 : i32
    %c0_i32_1 = arith.constant 0 : i32
    return %c0_i32, %c0_i32_0 : i32, i32
  }
  func.func @transform_3(%arg0: i32, %arg1: i32) -> (i32, i32) {
    %c0_i32 = arith.constant 0 : i32
    %c0_i32_0 = arith.constant 0 : i32
    %c0_i32_1 = arith.constant 0 : i32
    return %c0_i32, %c0_i32_0 : i32, i32
  }
  func.func @transform_4(%arg0: i32, %arg1: i32) -> (i32, i32, i32, i32) {
    %c0_i32 = arith.constant 0 : i32
    %c0_i32_0 = arith.constant 0 : i32
    %c0_i32_1 = arith.constant 0 : i32
    return %arg0, %arg1, %c0_i32, %c0_i32_0 : i32, i32, i32, i32
  }
}

module attributes {stable_mosaic.version = 11 : i64} {
  func.func @_apply_kernel(%arg0: i32, %arg1: i32, %arg2: memref<1x8x16xf32, #tpu.memory_space<vmem>>, %arg3: memref<1x1x8x2xf32, #tpu.memory_space<vmem>>, %arg4: memref<16x8xf32, #tpu.memory_space<vmem>>, %arg5: memref<8x3xf32, #tpu.memory_space<vmem>>, %arg6: memref<8x1xf32, #tpu.memory_space<vmem>>, %arg7: memref<8x4xf32, #tpu.memory_space<vmem>>, %arg8: memref<1x8x16xf32, #tpu.memory_space<vmem>>) attributes {dimension_semantics = [#tpu.dimension_semantics<parallel>, #tpu.dimension_semantics<parallel>], iteration_bounds = array<i64: 2, 1>, scalar_prefetch = 0 : i64, scratch_operands = 0 : i64, tpu.core_type = #tpu.core_type<tc>, window_params = [{transform_indices = @transform_0, window_bounds = array<i64: 1, 8, 16>}, {transform_indices = @transform_1, window_bounds = array<i64: 1, 1, 8, 2>}, {pipeline_mode = #tpu.pipeline_mode<synchronous>, transform_indices = @transform_2, window_bounds = array<i64: 16, 8>}, {pipeline_mode = #tpu.pipeline_mode<synchronous>, transform_indices = @transform_3, window_bounds = array<i64: 8, 3>}, {pipeline_mode = #tpu.pipeline_mode<synchronous>, transform_indices = @transform_4, window_bounds = array<i64: 8, 1>}, {pipeline_mode = #tpu.pipeline_mode<synchronous>, transform_indices = @transform_5, window_bounds = array<i64: 8, 4>}, {transform_indices = @transform_6, window_bounds = array<i64: 1, 8, 16>}]} {
    %c0 = arith.constant 0 : index
    %c0_0 = arith.constant 0 : index
    %c0_1 = arith.constant 0 : index
    %0 = vector.load %arg2[%c0, %c0_0, %c0_1] : memref<1x8x16xf32, #tpu.memory_space<vmem>>, vector<1x8x16xf32>
    %1 = vector.shape_cast %0 : vector<1x8x16xf32> to vector<8x16xf32>
    %c0_2 = arith.constant 0 : index
    %c0_3 = arith.constant 0 : index
    %c0_4 = arith.constant 0 : index
    %c0_5 = arith.constant 0 : index
    %2 = vector.load %arg3[%c0_2, %c0_3, %c0_4, %c0_5] : memref<1x1x8x2xf32, #tpu.memory_space<vmem>>, vector<1x1x8x2xf32>
    %3 = vector.shape_cast %2 : vector<1x1x8x2xf32> to vector<8x2xf32>
    %4 = vector.extract_strided_slice %3 {offsets = [0, 0], sizes = [8, 1], strides = [1, 1]} : vector<8x2xf32> to vector<8x1xf32>
    %5 = vector.extract_strided_slice %3 {offsets = [0, 1], sizes = [8, 1], strides = [1, 1]} : vector<8x2xf32> to vector<8x1xf32>
    %6 = tpu.concatenate %4, %1, %5 in 1 : vector<8x1xf32>, vector<8x16xf32>, vector<8x1xf32> -> vector<8x18xf32>
    %c0_6 = arith.constant 0 : index
    %c0_7 = arith.constant 0 : index
    %7 = vector.load %arg4[%c0_6, %c0_7] : memref<16x8xf32, #tpu.memory_space<vmem>>, vector<16x8xf32>
    %c0_8 = arith.constant 0 : index
    %c0_9 = arith.constant 0 : index
    %c0_10 = arith.constant 0 : index
    %8 = vector.load %arg2[%c0_8, %c0_9, %c0_10] : memref<1x8x16xf32, #tpu.memory_space<vmem>>, vector<1x8x16xf32>
    %9 = vector.shape_cast %8 : vector<1x8x16xf32> to vector<8x16xf32>
    %cst = arith.constant dense<0.000000e+00> : vector<16x16xf32>
    %10 = tpu.matmul %7, %9, %cst {dimension_numbers = #tpu.dot_dimension_numbers<[1], [0], [0], [1], [0, 0, 1, 1], [], []>} : vector<16x8xf32>, vector<8x16xf32>, vector<16x16xf32> -> vector<16x16xf32>
    %c0_11 = arith.constant 0 : index
    %c0_12 = arith.constant 0 : index
    %11 = vector.load %arg7[%c0_11, %c0_12] : memref<8x4xf32, #tpu.memory_space<vmem>>, vector<8x4xf32>
    %12 = vector.extract_strided_slice %10 {offsets = [8, 0], sizes = [8, 16], strides = [1, 1]} : vector<16x16xf32> to vector<8x16xf32>
    %13 = vector.extract_strided_slice %11 {offsets = [0, 0], sizes = [8, 1], strides = [1, 1]} : vector<8x4xf32> to vector<8x1xf32>
    %14 = vector.broadcast %13 : vector<8x1xf32> to vector<8x16xf32>
    %15 = arith.mulf %12, %14 : vector<8x16xf32>
    %16 = vector.extract_strided_slice %11 {offsets = [0, 1], sizes = [8, 1], strides = [1, 1]} : vector<8x4xf32> to vector<8x1xf32>
    %17 = vector.broadcast %16 : vector<8x1xf32> to vector<8x16xf32>
    %18 = arith.addf %15, %17 : vector<8x16xf32>
    %c0_13 = arith.constant 0 : index
    %c0_14 = arith.constant 0 : index
    %19 = vector.load %arg5[%c0_13, %c0_14] : memref<8x3xf32, #tpu.memory_space<vmem>>, vector<8x3xf32>
    %20 = vector.extract_strided_slice %19 {offsets = [0, 0], sizes = [8, 1], strides = [1, 1]} : vector<8x3xf32> to vector<8x1xf32>
    %21 = vector.extract_strided_slice %6 {offsets = [0, 0], sizes = [8, 16], strides = [1, 1]} : vector<8x18xf32> to vector<8x16xf32>
    %22 = vector.broadcast %20 : vector<8x1xf32> to vector<8x16xf32>
    %23 = arith.mulf %22, %21 : vector<8x16xf32>
    %24 = vector.extract_strided_slice %19 {offsets = [0, 1], sizes = [8, 1], strides = [1, 1]} : vector<8x3xf32> to vector<8x1xf32>
    %25 = vector.extract_strided_slice %6 {offsets = [0, 1], sizes = [8, 16], strides = [1, 1]} : vector<8x18xf32> to vector<8x16xf32>
    %26 = vector.broadcast %24 : vector<8x1xf32> to vector<8x16xf32>
    %27 = arith.mulf %26, %25 : vector<8x16xf32>
    %28 = arith.addf %23, %27 : vector<8x16xf32>
    %29 = vector.extract_strided_slice %19 {offsets = [0, 2], sizes = [8, 1], strides = [1, 1]} : vector<8x3xf32> to vector<8x1xf32>
    %30 = vector.extract_strided_slice %6 {offsets = [0, 2], sizes = [8, 16], strides = [1, 1]} : vector<8x18xf32> to vector<8x16xf32>
    %31 = vector.broadcast %29 : vector<8x1xf32> to vector<8x16xf32>
    %32 = arith.mulf %31, %30 : vector<8x16xf32>
    %33 = arith.addf %28, %32 : vector<8x16xf32>
    %34 = vector.extract_strided_slice %11 {offsets = [0, 2], sizes = [8, 1], strides = [1, 1]} : vector<8x4xf32> to vector<8x1xf32>
    %35 = vector.broadcast %34 : vector<8x1xf32> to vector<8x16xf32>
    %36 = arith.mulf %33, %35 : vector<8x16xf32>
    %37 = vector.extract_strided_slice %11 {offsets = [0, 3], sizes = [8, 1], strides = [1, 1]} : vector<8x4xf32> to vector<8x1xf32>
    %38 = vector.broadcast %37 : vector<8x1xf32> to vector<8x16xf32>
    %39 = arith.addf %36, %38 : vector<8x16xf32>
    %40 = vector.extract_strided_slice %10 {offsets = [0, 0], sizes = [8, 16], strides = [1, 1]} : vector<16x16xf32> to vector<8x16xf32>
    %c0_15 = arith.constant 0 : index
    %c0_16 = arith.constant 0 : index
    %41 = vector.load %arg6[%c0_15, %c0_16] : memref<8x1xf32, #tpu.memory_space<vmem>>, vector<8x1xf32>
    %42 = vector.broadcast %41 : vector<8x1xf32> to vector<8x16xf32>
    %43 = arith.addf %40, %42 : vector<8x16xf32>
    %cst_17 = arith.constant 2.000000e-01 : f32
    %44 = vector.broadcast %cst_17 : f32 to vector<8x16xf32>
    %45 = arith.mulf %44, %18 : vector<8x16xf32>
    %46 = arith.maximumf %18, %45 : vector<8x16xf32>
    %47 = arith.addf %43, %46 : vector<8x16xf32>
    %cst_18 = arith.constant 2.000000e-01 : f32
    %48 = vector.broadcast %cst_18 : f32 to vector<8x16xf32>
    %49 = arith.mulf %48, %39 : vector<8x16xf32>
    %50 = arith.maximumf %39, %49 : vector<8x16xf32>
    %51 = arith.addf %47, %50 : vector<8x16xf32>
    %c0_19 = arith.constant 0 : index
    %c0_20 = arith.constant 0 : index
    %c0_21 = arith.constant 0 : index
    %52 = vector.load %arg8[%c0_19, %c0_20, %c0_21] : memref<1x8x16xf32, #tpu.memory_space<vmem>>, vector<1x8x16xf32>
    %53 = vector.shape_cast %52 : vector<1x8x16xf32> to vector<8x16xf32>
    %54 = vector.shape_cast %51 : vector<8x16xf32> to vector<1x8x16xf32>
    tpu.vector_store %arg8[%c0_19, %c0_20, %c0_21], %54 {strides = array<i32>} : memref<1x8x16xf32, #tpu.memory_space<vmem>>, vector<1x8x16xf32>,
    return
  }
  func.func @transform_0(%arg0: i32, %arg1: i32) -> (i32, i32, i32) {
    %c0_i32 = arith.constant 0 : i32
    %c0_i32_0 = arith.constant 0 : i32
    return %arg0, %c0_i32, %arg1 : i32, i32, i32
  }
  func.func @transform_1(%arg0: i32, %arg1: i32) -> (i32, i32, i32, i32) {
    %c0_i32 = arith.constant 0 : i32
    %c0_i32_0 = arith.constant 0 : i32
    %c0_i32_1 = arith.constant 0 : i32
    return %arg0, %arg1, %c0_i32, %c0_i32_0 : i32, i32, i32, i32
  }
  func.func @transform_2(%arg0: i32, %arg1: i32) -> (i32, i32) {
    %c0_i32 = arith.constant 0 : i32
    %c0_i32_0 = arith.constant 0 : i32
    %c0_i32_1 = arith.constant 0 : i32
    return %c0_i32, %c0_i32_0 : i32, i32
  }
  func.func @transform_3(%arg0: i32, %arg1: i32) -> (i32, i32) {
    %c0_i32 = arith.constant 0 : i32
    %c0_i32_0 = arith.constant 0 : i32
    %c0_i32_1 = arith.constant 0 : i32
    return %c0_i32, %c0_i32_0 : i32, i32
  }
  func.func @transform_4(%arg0: i32, %arg1: i32) -> (i32, i32) {
    %c0_i32 = arith.constant 0 : i32
    %c0_i32_0 = arith.constant 0 : i32
    %c0_i32_1 = arith.constant 0 : i32
    return %c0_i32, %c0_i32_0 : i32, i32
  }
  func.func @transform_5(%arg0: i32, %arg1: i32) -> (i32, i32) {
    %c0_i32 = arith.constant 0 : i32
    %c0_i32_0 = arith.constant 0 : i32
    %c0_i32_1 = arith.constant 0 : i32
    return %c0_i32, %c0_i32_0 : i32, i32
  }
  func.func @transform_6(%arg0: i32, %arg1: i32) -> (i32, i32, i32) {
    %c0_i32 = arith.constant 0 : i32
    %c0_i32_0 = arith.constant 0 : i32
    return %arg0, %c0_i32, %arg1 : i32, i32, i32
  }
}

</mosaic_0001>

<bundles_post_ra>
// kernel: resblock1dtf.3
= control target key start
LH: loop header
LB: loop body
LE: loop exit
PB: predicated region body
PF: predicated region fallthrough
CT: control target
= control target key end

     0   :  { %11 = vsyncpa [#allocation3], 0  ;;  %s913_s0 = inlined_call_operand.vmem [shape: f32[2,8,16], index: 0, kind: input, shape index: {}]   ;;  %s914_s1 = inlined_call_operand.vmem [shape: f32[2,1,8,2], index: 1, kind: input, shape index: {}]   ;;  %s915_s2 = inlined_call_operand.vmem [shape: f32[16,8], index: 2, kind: input, shape index: {}]   ;;  %s916_s3 = inlined_call_operand.vmem [shape: f32[8,3], index: 3, kind: input, shape index: {}]   ;;  %s917_s4 = inlined_call_operand.vmem [shape: f32[8,1], index: 4, kind: input, shape index: {}]   ;;  %s918_s5 = inlined_call_operand.vmem [shape: f32[8,4], index: 5, kind: input, shape index: {}]   ;;  %s919_s6 = inlined_call_operand.hbm [shape: f32[2,8,16], index: 6, kind: output, shape index: {}]  }
   0x1   :  { %13 = vsyncpa [#allocation3 + $0x1], 0  ;;  %s781_s21 = smov 0   ;;  %s783_s22 = smov 0  }
   0x2   :  { %s785_s23 = smov 0   ;;  %s787_s24 = smov 0  }
   0x3   :  { %s789_s25 = smov 0   ;;  %s791_s26 = smov 0  }
   0x4 LB: > { %s563_s27 = sadd.s32 4294967295, %s735_s26   ;;  %s564_s28 = sadd.s32 4294967294, %s735_s26   ;;  %s735_s26 = sphi %s791_s26, %s19_s26   ;;  %s731_s25 = sphi %s789_s25, %s926_s25   ;;  %s727_s24 = sphi %s787_s24, %s925_s24   ;;  %s723_s23 = sphi %s785_s23, %s924_s23   ;;  %s719_s22 = sphi %s783_s22, %s923_s22   ;;  %s715_s21 = sphi %s781_s21, %s922_s21  }
   0x5   : > { %s31_s29 = sadd.s32 1, %s731_s25  ;;  %s180_s30 = sadd.s32 1, %s723_s23 }
   0x6   : > { %p33_p0 = scmp.ge.s32.totalorder %s31_s29, 2  ;;  %p190_p1 = scmp.ne.s32.totalorder %s723_s23, %s719_s22 }
   0x7   : > { %p191_p2 = scmp.eq.s32.totalorder %s563_s27, 1  ;;  %p196_p3 = scmp.ne.s32.totalorder %s719_s22, %s715_s21 }
   0x8   : > { %s928_s29 = smov (%p33_p0, %s31_s29), 0  ;;  %p197_p5 = scmp.eq.s32.totalorder %s564_s28, 1 }
   0x9   : > { %p821_p4 = por %p191_p2, %p190_p1  ;;  %s175_s8 = ssub.s32 %s731_s25, %s928_s29 }
   0xa   : > { %p567_p6 = scmp.ge.s32.totalorder %s735_s26, 1  ;;  %p178_p7 = scmp.eq.s32.totalorder %s175_s8, 0 }
   0xb   : > { %p828_p8 = por %p197_p5, %p196_p3  ;;  %p247_p9 = scmp.lt.s32.totalorder %s735_s26, 3 }
   0xc   : > { %s834_s10 = scalar_select %p178_p7, %s723_s23, %s180_s30  }
   0xd   : > { %p248_p10 = pnand %p567_p6, %p247_p9 }
   0xe   : > { %v410_v0 = vld [vmem:[%s916_s3] sm:$0xff] (!%p248_p10)  ;;  %p286_p11 = scmp.lt.s32.totalorder (!%p248_p10), %s727_s24, 1  ;;  %v737_v1 = vmov (!%p248_p10), 1   ;;  %v738_v2 = vmov (!%p248_p10), 0   ;;  %vm316_vm0 = vcmask (!%p248_p10), 64512   ;;  %v739_v4 = vmov (!%p248_p10), 2  }
   0xf   : > { %251 = sbr.rel (%p248_p10) target bundleno = 301 (0x12d), region = 44  ;;  %648 = vset.pattern.permute.xlu0 (!%p248_p10), %v737_v1  ;;  %650 = vset.pattern.permute.xlu1 (!%p248_p10), %v738_v2  ;;  %v314_v3 = vld [vmem:[%s915_s2] sm:$0xff] (!%p248_p10)  ;;  %s740_s30 = smov (!%p248_p10), 1   ;;  %v315_v6 = vld [vmem:[%s915_s2 + $0x8] sm:$0xff] (!%p248_p10)  ;;  %v742_v9 = vmov (!%p248_p10), 3   ;;  %vm310_vm1 = vcmask (!%p248_p10), 7168  }
  0x10   : > { %418 = vperm.xlu0 (!%p248_p10), %648, %v410_v0   ;;  %582 = vmatprep.mubr.msk.f32.mxu0 (!%p248_p10), %vm316_vm0, %v314_v3  ;;  %s741_s12 = smov (!%p248_p10), 16   ;;  %v398_v8 = vld [vmem:[%s918_s5] sm:$0xff] (!%p248_p10)  ;;  %vm312_vm2 = vcmask (!%p248_p10), 138240   ;;  %s744_s18 = smov (!%p248_p10), 126   ;;  %vm460_vm3 = vcmask (!%p248_p10), 130048  }
  0x11   : > { %v447_v16 = vld [vmem:[%s917_s4] sm:$0xff] (!%p248_p10)  ;;  %s574_s27 = sshll.u32 (!%p248_p10), %s727_s24, 7 }
  0x14   : > { %649 = vset.pattern.permute.xlu0 (!%p248_p10), %v739_v4 }
  0x15   : > { %428 = vperm.xlu0 (!%p248_p10), %649, %v410_v0  }
  0x16   : > { %s287_s15 = scalar_select %p286_p11, %s727_s24, 1 }
  0x17   : > { %s745_s24 = smov [#allocation2]  }
  0x18   : > { %s569_s16 = sshll.u32 %s287_s15, 3  ;;  %s743_s15 = smov 127  }
  0x19   : > { %s292_s19 = scalar_lea.vmem %s913_s0, %s569_s16  ;;  %s299_s28 = scalar_lea.vmem %s914_s1, %s569_s16  ;;  %651 = vset.pattern.permute.xlu0 %v738_v2 }
  0x1a   : > { %v300_v5 = vld [vmem:[%s292_s19] sm:$0xff]  ;;  %401 = vperm.xlu0 %651, %v398_v8   ;;  %s283_s19 = sand.u32 1, %s719_s22  }
  0x1b   : > { %303 = vrot.lane.b32.xlu1 %v300_v5, %s740_s30  ;;  %v301_v7 = vld [vmem:[%s299_s28] sm:$0xff]  ;;  %580 = vmatprep.subr.mxu0 %v300_v5  ;;  %s568_s20 = sshll.u32 %s283_s19, 3  ;;  %s463_s13 = scalar_lea.sflag [#allocation3], %s283_s19 }
  0x1c   : > { %581 = vmatpush3.msra.mxu0 %v300_v5  ;;  %s285_s28 = scalar_lea.vmem [#allocation2], %s568_s20 }
  0x1d   : > { %583 = vmatmul.mubr.msk.f32.vlgmr.msra.gmra.mrb[0].mxu0 %vm316_vm0, %v315_v6  ;;  %s477_s30 = sshll.u32 %s285_s28, 4  ;;  %s868_s30 = int_to_ptr.vmem [resolvable:$true] %s477_s30 }
  0x1e   : > { %654 = vset.pattern.permute.xlu0 %v742_v9  ;;  %s657_s14 = scalar_lea.vmem %s868_s30, 128 }
  0x1f   : > { %307 = vrot.lane.b32.xlu1 %v301_v7, %s741_s12  ;;  %443 = vperm.xlu0 %654, %v398_v8   ;;  %s866_s12 = scalar_lea.hbm %s919_s6, %s574_s27  ;;  %p658_p12 = scmp.ne.s32.totalorder %s868_s30, %s657_s14 }
  0x21   : > { %p659_p13 = pnand %p658_p12, %p821_p4 }
  0x23   : > { %413 = vperm.xlu1 %650, %v410_v0   ;;  %656 = vset.pattern.permute.xlu0 %v738_v2  ;;  %p660_p0 = pneg %p659_p13 }
  0x27   : > { %652 = vset.pattern.permute.xlu1 %v737_v1 }
  0x28   : > { %406 = vperm.xlu1 %652, %v398_v8  }
  0x2c   : > { %653 = vset.pattern.permute.xlu1 %v739_v4 }
  0x2d   : > { %438 = vperm.xlu1 %653, %v398_v8  }
  0x31   : > { %655 = vset.pattern.permute.xlu1 %v738_v2 }
  0x8d   : > { %v304_v10 = vpop.permute.xlu1 %303 }
  0x8e   : > { %v311_v11 = vsel %vm310_vm1, %v301_v7, %v304_v10 }
  0x8f   : > { %v419_v14 = vpop.permute.xlu0 %418 }
  0x91   : > { %v308_v12 = vpop.permute.xlu1 %307 }
  0x92   : > { %v313_v13 = vsel %vm312_vm2, %v311_v11, %v308_v12 }
  0x93   : > { %v421_v15 = vmul.f32 %v419_v14, %v313_v13 }
  0x94   : > { %v429_v17 = vpop.permute.xlu0 %428 }
  0x95   : > { %423 = vrot.lane.b32.xlu1 %v421_v15, %s743_s15  ;;  %v431_v18 = vmul.f32 %v429_v17, %v313_v13  ;;  %s661_s15 = sshll.u32 %s745_s24, 4  ;;  %s662_s15 = int_to_ptr.vmem [resolvable:$false] %s661_s15 }
  0x96   : > { %s663_s16 = scalar_lea.vmem %s662_s15, 256  ;;  %p664_p1 = scmp.lt.s32.totalorder %s868_s30, %s662_s15 }
  0x97   : > { %433 = vrot.lane.b32.xlu0 %v431_v18, %s744_s18  ;;  %p665_p2 = scmp.lt.s32.totalorder %s663_s16, %s657_s14 }
  0x99   : > { %450 = vperm.xlu1 %655, %v447_v16   ;;  %v402_v23 = vpop.permute.xlu0 %401  ;;  %p666_p3 = por %p665_p2, %p664_p1 }
  0x9b   : > { %p667_p5 = pnand %p666_p3, %p660_p0 }
  0x9e   : > { %v444_v25 = vpop.permute.xlu0 %443 }
  0xa2   : > { %v414_v21 = vpop.permute.xlu1 %413 }
  0xa3   : > { %v416_v27 = vmul.f32 %v414_v21, %v313_v13 }
  0xa7   : > { %v407_v22 = vpop.permute.xlu1 %406 }
  0xac   : > { %v439_v24 = vpop.permute.xlu1 %438 }
  0xf0   : > { %v584_v19 = vpop.f32.mrb[0].mxu0 }
  0xf1   : > { %v389_v20 = vpop.f32.mrb[1].mxu0  ;;  %v404_v30 = vmul.f32 %v584_v19, %v402_v23 }
  0xf3   : > { %v409_v33 = vadd.f32 %v407_v22, %v404_v30 }
  0xf5   : > { %v454_v35 = vmul.f32 0.2, %v409_v33 }
  0xf7   : > { %v455_v39 = vmax.f32 %v409_v33, %v454_v35 }
 0x107   : > { %v424_v26 = vpop.permute.xlu1 %423 }
 0x108   : > { %v426_v28 = vadd.f32 %v424_v26, %v416_v27 }
 0x109   : > { %v434_v29 = vpop.permute.xlu0 %433 }
 0x10a   : > { %v436_v31 = vadd.f32 %v434_v29, %v426_v28 }
 0x10c   : > { %v441_v32 = vmul.f32 %v439_v24, %v436_v31 }
 0x10e   : > { %v446_v34 = vadd.f32 %v444_v25, %v441_v32 }
 0x110   : > { %v457_v36 = vmul.f32 0.2, %v446_v34 }
 0x112   : > { %v458_v40 = vmax.f32 %v446_v34, %v457_v36 }
 0x118   : > { %v451_v37 = vpop.permute.xlu1 %450 }
 0x119   : > { %v453_v38 = vadd.f32 %v451_v37, %v389_v20 }
 0x11b   : > { %v456_v41 = vadd.f32 %v455_v39, %v453_v38 }
 0x11d   : > { %v459_v42 = vadd.f32 %v458_v40, %v456_v41 }
 0x11f   : > { %461 = vst.msk [vmem:[%s285_s28] sm:$0xff] %vm460_vm3, %v459_v42 }
 0x120   : > { %670 = shalt.err (!%p667_p5)
}
 0x121   : > { %s671_s17 = scalar_lea.hbm %s866_s12, 128  ;;  %s675_s20 = scalar_lea.hbm %s919_s6, 256 }
 0x122   : > { %p672_p6 = scmp.ne.s32.totalorder %s866_s12, %s671_s17  ;;  %p676_p10 = scmp.lt.u32.totalorder %s866_s12, %s919_s6 }
 0x123   : > { %p677_p11 = scmp.lt.u32.totalorder %s675_s20, %s671_s17  ;;  %p679_p13 = scmp.lt.u32.totalorder %s671_s17, %s866_s12 }
 0x124   : > { %p673_p7 = pnand %p672_p6, %p821_p4 }
 0x125   : > { %p678_p12 = por %p677_p11, %p676_p10 }
 0x126   : > { %p674_p9 = pneg %p673_p7 }
 0x127   : > { %p680_p0 = por %p679_p13, %p678_p12 }
 0x129   : > { %p681_p1 = pnand %p680_p0, %p674_p9 }
 0x12b   : > { %684 = shalt.err (!%p681_p1)
}
 0x12c   : > { %585 = dma.vmem_to_hbm [thread:$0]  (%p821_p4), %s868_s30, 128, %s866_s12, %s463_s13  }
 0x12d PF: > { %p591_p2 = scmp.ge.s32.totalorder %s735_s26, 2  ;;  %s489_s8 = sand.u32 1, %s715_s21  }
 0x12e   : > { %s490_s11 = scalar_lea.sflag [#allocation3], %s489_s8 }
 0x12f   : > { %p588_p3 = pnand %p591_p2, %p828_p8 }
 0x131   : > { %710 = dma.done.wait (!%p588_p3), %s490_s11, 128  }
 0x132   : > { %712 = vsyncadd (!%p588_p3), %s490_s11, 4294967168  ;;  %s19_s26 = sadd.s32 1, %s735_s26   ;;  %s922_s21 = smov %s719_s22 }
 0x133   : > { %p16_p5 = scmp.ge.s32.totalorder %s19_s26, 4   ;;  %s923_s22 = smov %s723_s23 }
 0x134   : > { %s924_s23 = smov %s834_s10  ;;  %s925_s24 = smov %s731_s25 }
 0x135   : > { %s926_s25 = smov %s928_s29  ;;  %18 = sbr.rel (!%p16_p5) target bundleno = 4 (0x4), region = 82 }
 0x13c   :  { %495 = vsyncpa [#allocation3], 1 }
 0x13d   :  { %497 = vsyncpa [#allocation3 + $0x1], 1 }

// kernel: resblock1dtf.2
= control target key start
LH: loop header
LB: loop body
LE: loop exit
PB: predicated region body
PF: predicated region fallthrough
CT: control target
= control target key end

     0   :  { %s605_s15 = smov 0   ;;  %s607_s16 = smov 0   ;;  %s662_s0 = inlined_call_operand.vmem [shape: f32[2,8,16], index: 0, kind: input, shape index: {}]   ;;  %s663_s1 = inlined_call_operand.vmem [shape: f32[2,1,8,2], index: 1, kind: input, shape index: {}]   ;;  %s664_s2 = inlined_call_operand.vmem [shape: f32[8,8], index: 2, kind: input, shape index: {}]   ;;  %s665_s3 = inlined_call_operand.vmem [shape: f32[8,3], index: 3, kind: input, shape index: {}]   ;;  %s666_s4 = inlined_call_operand.vmem [shape: f32[2,1,8,4], index: 4, kind: output, shape index: {}]  }
   0x1   :  { %s609_s17 = smov 0  }
   0x2 LB: > { %s26_s18 = sadd.s32 1, %s565_s16  ;;  %p497_p0 = scmp.ge.s32.totalorder %s569_s17, 1  ;;  %s569_s17 = sphi %s609_s17, %s14_s17   ;;  %s565_s16 = sphi %s607_s16, %s668_s16   ;;  %s561_s15 = sphi %s605_s15, %s667_s15  }
   0x3   : > { %p28_p1 = scmp.ge.s32.totalorder %s26_s18, 2  ;;  %p194_p2 = scmp.lt.s32.totalorder %s569_s17, 3 }
   0x5   : > { %s670_s18 = smov (%p28_p1, %s26_s18), 0  ;;  %p195_p3 = pnand %p497_p0, %p194_p2 }
   0x6   : > { %v345_v0 = vld [vmem:[%s665_s3] sm:$0xff] (!%p195_p3)  ;;  %p231_p4 = scmp.lt.s32.totalorder (!%p195_p3), %s561_s15, 1  ;;  %v571_v1 = vmov (!%p195_p3), 1   ;;  %v572_v2 = vmov (!%p195_p3), 0   ;;  %v573_v3 = vmov (!%p195_p3), 0.0   ;;  %vm574_vm0 = vmmov (!%p195_p3), 0  }
   0x7   : > { %198 = sbr.rel (%p195_p3) target bundleno = 410 (0x19a), region = 36  ;;  %544 = vset.pattern.permute.xlu0 (!%p195_p3), %v571_v1  ;;  %546 = vset.pattern.permute.xlu1 (!%p195_p3), %v572_v2  ;;  %v575_v4 = vmov (!%p195_p3), 2   ;;  %v270_v6 = vld [vmem:[%s664_s2] sm:$0xff] (!%p195_p3)  ;;  %vm271_vm1 = vcmask (!%p195_p3), 64512   ;;  %s576_s30 = smov (!%p195_p3), 1   ;;  %vm266_vm2 = vcmask (!%p195_p3), 7168   ;;  %v372_v16 = vlaneseq (!%p195_p3) }
   0x8   : > { %353 = vperm.xlu0 (!%p195_p3), %544, %v345_v0   ;;  %506 = vmatprep.subr.mxu0 (!%p195_p3), %v573_v3  ;;  %s577_s5 = smov (!%p195_p3), 16   ;;  %vm268_vm3 = vcmask (!%p195_p3), 138240   ;;  %s578_s6 = smov (!%p195_p3), 127   ;;  %vm379_vm5 = vcmask (!%p195_p3), 130048   ;;  %vm398_vm6 = vcmask (!%p195_p3), 15360   ;;  %vm400_vm7 = vcmask (!%p195_p3), 23552  }
   0x9   : > { %508 = vmatprep.mubr.msk.f32.mxu0 (!%p195_p3), %vm574_vm0, %v573_v3  ;;  %s579_s7 = smov (!%p195_p3), 126   ;;  %v373_v17 = vand.u32 (!%p195_p3), 127, %v372_v16  ;;  %vm402_vm8 = vcmask (!%p195_p3), 31744  }
   0xb   : > { %vm375_vm4 = vcmp.lt.s32.totalorder (!%p195_p3), %v373_v17, 16 }
   0xc   : > { %545 = vset.pattern.permute.xlu0 (!%p195_p3), %v575_v4 }
   0xd   : > { %363 = vperm.xlu0 (!%p195_p3), %545, %v345_v0  }
   0xe   : > { %s672_s15 = smov (!%p231_p4, %s561_s15), 1 }
   0xf   : > { %s626_s21 = sshll.u32 %s672_s15, 3 }
  0x10   : > { %s237_s24 = scalar_lea.vmem %s662_s0, %s626_s21  ;;  %s244_s27 = scalar_lea.vmem %s663_s1, %s626_s21 }
  0x11   : > { %v256_v5 = vld [vmem:[%s237_s24] sm:$0xff]  ;;  %s251_s10 = scalar_lea.vmem %s666_s4, %s626_s21 }
  0x12   : > { %259 = vrot.lane.b32.xlu1 %v256_v5, %s576_s30  ;;  %v257_v7 = vld [vmem:[%s244_s27] sm:$0xff]  ;;  %507 = vmatpush3.msra.mxu0 %v256_v5 }
  0x13   : > { %509 = vmatmul.mubr.msk.f32.vlgmr.msra.gmra.mrb[0].mxu0 %vm271_vm1, %v270_v6 }
  0x16   : > { %263 = vrot.lane.b32.xlu1 %v257_v7, %s577_s5 }
  0x1a   : > { %348 = vperm.xlu1 %546, %v345_v0  }
  0x84   : > { %v260_v8 = vpop.permute.xlu1 %259 }
  0x85   : > { %v267_v9 = vsel %vm266_vm2, %v257_v7, %v260_v8 }
  0x87   : > { %v354_v12 = vpop.permute.xlu0 %353 }
  0x88   : > { %v264_v10 = vpop.permute.xlu1 %263 }
  0x89   : > { %v269_v11 = vsel %vm268_vm3, %v267_v9, %v264_v10 }
  0x8a   : > { %v356_v13 = vmul.f32 %v354_v12, %v269_v11 }
  0x8c   : > { %358 = vrot.lane.b32.xlu0 %v356_v13, %s578_s6  ;;  %v364_v14 = vpop.permute.xlu0 %363 }
  0x8d   : > { %v366_v15 = vmul.f32 %v364_v14, %v269_v11 }
  0x8f   : > { %368 = vrot.lane.b32.xlu1 %v366_v15, %s579_s7 }
  0x99   : > { %v349_v25 = vpop.permute.xlu1 %348 }
  0x9a   : > { %v351_v27 = vmul.f32 %v349_v25, %v269_v11 }
  0xe6   : > { %v341_v18 = vpop.f32.mrb[0].mxu0 }
  0xe7   : > { %v383_v19 = vmul.f32 %v341_v18, %v341_v18  ;;  %v510_v20 = vpop.f32.mrb[1].mxu0  ;;  %v378_v21 = vsel %vm375_vm4, %v341_v18, 0.0 }
  0xe8   : > { %v380_v22 = vsel %vm379_vm5, %v378_v21, 0.0 }
  0xe9   : > { %v384_v23 = vsel %vm375_vm4, %v383_v19, 0.0  ;;  %381 = vadd.xlane.f32.xlu0 %v380_v22 }
  0xea   : > { %v385_v24 = vsel %vm379_vm5, %v384_v23, 0.0 }
  0xeb   : > { %386 = vadd.xlane.f32.xlu1 %v385_v24 }
  0xfe   : > { %v359_v26 = vpop.permute.xlu0 %358 }
  0xff   : > { %v361_v28 = vadd.f32 %v359_v26, %v351_v27 }
 0x101   : > { %v369_v29 = vpop.permute.xlu1 %368 }
 0x102   : > { %v371_v30 = vadd.f32 %v369_v29, %v361_v28 }
 0x104   : > { %v392_v31 = vmul.f32 %v371_v30, %v371_v30  ;;  %v388_v32 = vsel %vm375_vm4, %v371_v30, 0.0 }
 0x105   : > { %v389_v33 = vsel %vm379_vm5, %v388_v32, 0.0 }
 0x106   : > { %390 = vadd.xlane.f32.xlu0 %v389_v33  ;;  %v393_v34 = vsel %vm375_vm4, %v392_v31, 0.0 }
 0x107   : > { %v394_v35 = vsel %vm379_vm5, %v393_v34, 0.0 }
 0x10a   : > { %395 = vadd.xlane.f32.xlu0 %v394_v35 }
 0x176   : > { %v382_v36 = vpop.xlane.xlu0 %381 }
 0x178   : > { %v387_v37 = vpop.xlane.xlu1 %386 }
 0x179   : > { %v397_v39 = vsel %vm266_vm2, %v382_v36, %v387_v37 }
 0x193   : > { %v391_v38 = vpop.xlane.xlu0 %390 }
 0x194   : > { %v399_v40 = vsel %vm398_vm6, %v397_v39, %v391_v38 }
 0x197   : > { %v396_v41 = vpop.xlane.xlu0 %395 }
 0x198   : > { %v401_v42 = vsel %vm400_vm7, %v399_v40, %v396_v41 }
 0x199   : > { %403 = vst.msk [vmem:[%s251_s10] sm:$0xff] %vm402_vm8, %v401_v42 }
 0x19a PF: > { %s14_s17 = sadd.s32 1, %s569_s17   ;;  %s667_s15 = smov %s565_s16 }
 0x19b   : > { %p11_p5 = scmp.ge.s32.totalorder %s14_s17, 4   ;;  %s668_s16 = smov %s670_s18 }
 0x19d   :  { %13 = sbr.rel (!%p11_p5) target bundleno = 2 (0x2), region = 69 }

</bundles_post_ra>
